<compile_context>
chip_gen: v7x
topology: tpu7x:2x2x1
jax: 0.10.0
libtpu: 0.0.40
codegen_flags: <defaults>
</compile_context>

<pallas_src>
import math

import jax
import jax.numpy as jnp
from jax.experimental import pallas as pl
from jax.experimental.pallas import tpu as pltpu


def mean_readout_kernel(node_ref, mask_ref, state_ref,
                        wh_ref, wst_ref, b_ref, out_ref, acc_ref):
    # node_ref : [Bt, Nt, E] bf16    mask_ref : [Bt, Nt] bf16 (0/1, exact)
    # state_ref: [Bt, S]     bf16
    # wh_ref   : [E, E] bf16 = Wo[:, :E]^T * (1/N)   (mean scale folded in)
    # wst_ref  : [S, E] bf16 = Ws^T @ Wo[:, E:]^T    (state linear folded in)
    # b_ref    : [1, E] f32  = bo + bs @ Wo[:, E:]^T
    # acc_ref  : [Bt, E] f32 scratch (masked node sum, persists over node axis)
    k = pl.program_id(1)

    @pl.when(k == 0)
    def _init():
        acc_ref[...] = jnp.zeros_like(acc_ref)

    node = node_ref[...]                               # [Bt, Nt, E]
    mask = mask_ref[...]                               # [Bt, Nt]
    # VPU multiply (exact: mask is 0/1) + f32 sublane/XLU reduce over nodes.
    # Keeps the MXU out of the mean — M=1 per-batch matmuls would waste it.
    masked = (node * mask[:, :, None]).astype(jnp.float32)
    acc_ref[...] += jnp.sum(masked, axis=1)            # [Bt, E] f32

    @pl.when(k == pl.num_programs(1) - 1)
    def _finalize():
        # bf16 operands, f32 accumulation on the MXU (single-pass on all gens).
        h = acc_ref[...].astype(jnp.bfloat16)
        out = (jnp.dot(h, wh_ref[...], preferred_element_type=jnp.float32)
               + jnp.dot(state_ref[...], wst_ref[...],
                         preferred_element_type=jnp.float32)
               + b_ref[...])
        out_ref[...] = out.astype(out_ref.dtype)


def _round_up(x, m):
    return ((x + m - 1) // m) * m


def _choose_tiles(B, N, E, S, *, node_itemsize, budget_bytes):
    """Pick (b_tile, n_tile): all double-buffered blocks + resident weights
    must fit `budget_bytes` (caller already left headroom vs vmem_limit)."""
    pB = _round_up(max(B, 1), 8)

    def block_bytes(bt, nt):
        node = bt * nt * E * node_itemsize
        mask = bt * nt * node_itemsize
        state = bt * S * node_itemsize
        out = bt * E * 4
        acc = bt * E * 4
        weights = (E * E + S * E) * node_itemsize + E * 4
        return 2 * (node + mask + state + out + weights) + acc

    bt_candidates = [bt for bt in range(8, pB + 1, 8) if pB % bt == 0]

    # Prefer keeping the whole node axis in one block (no reduction grid axis).
    b_tile = None
    for bt in bt_candidates:
        if block_bytes(bt, N) <= budget_bytes:
            b_tile = bt
    if b_tile is not None:
        n_tile = N
    else:
        # Large graphs: tile the node axis. The mask's last dim forces
        # n_tile % 128 == 0 (node block is fine: n_tile is its sublane dim).
        n_tile = 128
        while 2 * n_tile < N and block_bytes(8, 2 * n_tile) <= budget_bytes:
            n_tile *= 2
        b_tile = 8
        for bt in bt_candidates:
            if block_bytes(bt, n_tile) <= budget_bytes:
                b_tile = bt

    # Prefer >= 2 batch steps so dimension_semantics=("parallel", ...) can
    # feed both v7x TensorCores; the extra grid step is ~free on v5e/v6e.
    if pB // b_tile < 2 and pB % 16 == 0:
        b_tile = pB // 2

    return b_tile, n_tile


def mean_readout(node_emb, mask, state, params, *, b_tile=None, n_tile=None):
    """Forward pass of MeanReadout (eval mode) as one gridded Pallas call."""
    B, N, E = node_emb.shape
    S = state.shape[-1]
    # TODO(synk): state_dim == 0 branch of the module (no state linear /
    # concat) is not implemented; this wrapper assumes state is present.
    assert S > 0, "state_dim == 0 branch not implemented"

    ws, bs, wo, bo = params["ws"], params["bs"], params["wo"], params["bo"]
    wo_h = wo[:, :E]                               # [E, E] (acts on mean part)
    wo_s = wo[:, E:]                               # [E, E] (acts on state part)

    # One-time (XLA-side) transposes / algebraic folds — exact in eval mode.
    # Streamed operands are bf16 (kernel is HBM-bound); accumulation stays f32.
    cd = jnp.bfloat16
    w_h = (wo_h.T * (1.0 / float(N))).astype(cd)                      # [E, E]
    w_st = (ws.T.astype(jnp.float32) @ wo_s.T.astype(jnp.float32)).astype(cd)
    b_eff = (bo + bs @ wo_s.T).reshape(1, E).astype(jnp.float32)      # [1, E]

    # Per-generation VMEM budgets: ~75% of physical as the scoped limit
    # (v5e/v6e: 128 MiB -> ~96 MiB; v7x: 64 MiB/TC -> 48 MiB), and ~75% of
    # that for the pipelined blocks, leaving headroom for compiler scratch.
    try:
        vmem_cap = int(pltpu.get_tpu_info().vmem_capacity_bytes)
    except Exception:
        vmem_cap = 64 << 20                       # conservative (v7x-sized)
    vmem_limit = min((vmem_cap * 3) // 4, 100 << 20)
    block_budget = (vmem_limit * 3) // 4

    auto_bt, auto_nt = _choose_tiles(B, N, E, S, node_itemsize=2,
                                     budget_bytes=block_budget)
    if b_tile is None:
        b_tile = auto_bt
    if n_tile is None:
        n_tile = auto_nt
    assert b_tile % 8 == 0, "b_tile must be a multiple of 8 (sublane rule)"
    assert n_tile == N or n_tile % 128 == 0, \
        "a tiled node axis must be a multiple of 128 (mask lane rule)"

    pB = _round_up(B, b_tile)
    pN = N if n_tile == N else _round_up(N, n_tile)

    node_c = node_emb.astype(cd)
    mask_c = mask.astype(cd)                      # cast once here: no int->f
    state_c = state.astype(cd)                    # convert inside the kernel
    if pB != B or pN != N:                        # zero padding is exact
        node_c = jnp.pad(node_c, ((0, pB - B), (0, pN - N), (0, 0)))
        mask_c = jnp.pad(mask_c, ((0, pB - B), (0, pN - N)))
    if pB != B:
        state_c = jnp.pad(state_c, ((0, pB - B), (0, 0)))

    grid = (pB // b_tile, pN // n_tile)

    # NOTE: output last dim E may be < 128 (masked vst); output traffic is
    # <= 1/N of the node stream, so we amortize it with a large b_tile instead
    # of repacking the output lane-dense.
    out = pl.pallas_call(
        mean_readout_kernel,
        out_shape=jax.ShapeDtypeStruct((pB, E), jnp.float32),
        grid_spec=pltpu.PrefetchScalarGridSpec(
            num_scalar_prefetch=0,
            grid=grid,
            in_specs=[
                pl.BlockSpec((b_tile, n_tile, E), lambda i, k: (i, k, 0)),
                pl.BlockSpec((b_tile, n_tile), lambda i, k: (i, k)),
                pl.BlockSpec((b_tile, S), lambda i, k: (i, 0)),
                # Constant-index weight/bias blocks: tiny, fetched once.
                pl.BlockSpec((E, E), lambda i, k: (0, 0)),
                pl.BlockSpec((S, E), lambda i, k: (0, 0)),
                pl.BlockSpec((1, E), lambda i, k: (0, 0)),
            ],
            out_specs=pl.BlockSpec((b_tile, E), lambda i, k: (i, 0)),
            scratch_shapes=[pltpu.VMEM((b_tile, E), jnp.float32)],
        ),
        compiler_params=pltpu.CompilerParams(
            dimension_semantics=("parallel", "arbitrary"),
            vmem_limit_bytes=int(vmem_limit),
        ),
    )(node_c, mask_c, state_c, w_h, w_st, b_eff)

    return out[:B]


def init_params(key, state_dim, emb_dim):
    """Re-implementation of MeanReadout.reset_parameters:
    every parameter ~ U(-1/sqrt(last_dim), 1/sqrt(last_dim))."""
    k1, k2, k3, k4 = jax.random.split(key, 4)

    def u(k, shape):
        stdv = 1.0 / math.sqrt(shape[-1])
        return jax.random.uniform(k, shape, jnp.float32, -stdv, stdv)

    ws = u(k1, (emb_dim, state_dim))          # init_linear_state.weight [E, S]
    bs = u(k2, (emb_dim,))                    # init_linear_state.bias   [E]
    wo = u(k3, (emb_dim, 2 * emb_dim))        # out_linear.weight        [E, 2E]
    bo = u(k4, (emb_dim,))                    # out_linear.bias          [E]
    return {"ws": ws, "bs": bs, "wo": wo, "bo": bo}


def reference(node_emb, mask, state, params):
    """Pure-JAX f32 reference mirroring the PyTorch forward (eval mode)."""
    m = mask.astype(node_emb.dtype)[:, :, None]
    h = jnp.mean(node_emb * m, axis=1)
    state_emb = state @ params["ws"].T + params["bs"]
    cat = jnp.concatenate([h, state_emb], axis=-1)
    return cat @ params["wo"].T + params["bo"]


if __name__ == "__main__":
    B, N, E, S = 2, 8, 32, 16  # batch, num_nodes, emb_dim, state_dim

    key = jax.random.PRNGKey(0)
    k_node, k_mask, k_state, k_param = jax.random.split(key, 4)

    node_emb = jax.random.normal(k_node, (B, N, E), jnp.float32)
    mask = (jax.random.uniform(k_mask, (B, N)) > 0.3).astype(jnp.int32)  # LongTensor mask
    state = jax.random.normal(k_state, (B, S), jnp.float32)
    params = init_params(k_param, S, E)

    out = jax.block_until_ready(mean_readout(node_emb, mask, state, params))

    ref = reference(node_emb, mask, state, params)
    assert out.shape == (B, E)
    # Operands are streamed in bf16 (f32 accumulation), so compare against the
    # pure-f32 reference at bf16-level tolerance.
    assert jnp.allclose(out, ref, atol=2e-2, rtol=2e-2), "mismatch vs reference"

    print("KERNEL_OK")
</pallas_src>

<mosaic_0001>
module attributes {stable_mosaic.version = 11 : i64} {
  func.func @mean_readout_kernel(%arg0: i32, %arg1: i32, %arg2: memref<8x8x32xbf16, #tpu.memory_space<vmem>>, %arg3: memref<8x8xbf16, #tpu.memory_space<vmem>>, %arg4: memref<8x16xbf16, #tpu.memory_space<vmem>>, %arg5: memref<32x32xbf16, #tpu.memory_space<vmem>>, %arg6: memref<16x32xbf16, #tpu.memory_space<vmem>>, %arg7: memref<1x32xf32, #tpu.memory_space<vmem>>, %arg8: memref<8x32xf32, #tpu.memory_space<vmem>>, %arg9: memref<8x32xf32, #tpu.memory_space<vmem>>) attributes {dimension_semantics = [#tpu.dimension_semantics<parallel>, #tpu.dimension_semantics<arbitrary>], iteration_bounds = array<i64: 1, 1>, scalar_prefetch = 0 : i64, scratch_operands = 1 : i64, tpu.core_type = #tpu.core_type<tc>, window_params = [{transform_indices = @transform_0, window_bounds = array<i64: 8, 8, 32>}, {transform_indices = @transform_1, window_bounds = array<i64: 8, 8>}, {transform_indices = @transform_2, window_bounds = array<i64: 8, 16>}, {pipeline_mode = #tpu.pipeline_mode<synchronous>, transform_indices = @transform_3, window_bounds = array<i64: 32, 32>}, {pipeline_mode = #tpu.pipeline_mode<synchronous>, transform_indices = @transform_4, window_bounds = array<i64: 16, 32>}, {pipeline_mode = #tpu.pipeline_mode<synchronous>, transform_indices = @transform_5, window_bounds = array<i64: 1, 32>}, {transform_indices = @transform_6, window_bounds = array<i64: 8, 32>}]} {
    %c0_i32 = arith.constant 0 : i32
    %0 = arith.cmpi eq, %arg1, %c0_i32 : i32
    %1 = arith.extui %0 : i1 to i32
    %c0_i32_0 = arith.constant 0 : i32
    %2 = arith.cmpi ne, %1, %c0_i32_0 : i32
    scf.if %2 {
      %cst_11 = arith.constant 0.000000e+00 : f32
      %16 = vector.broadcast %cst_11 : f32 to vector<8x32xf32>
      %c0_12 = arith.constant 0 : index
      %c0_13 = arith.constant 0 : index
      %17 = vector.load %arg9[%c0_12, %c0_13] : memref<8x32xf32, #tpu.memory_space<vmem>>, vector<8x32xf32>
      tpu.vector_store %arg9[%c0_12, %c0_13], %16 {strides = array<i32>} : memref<8x32xf32, #tpu.memory_space<vmem>>, vector<8x32xf32>,
    } else {
    }
    %c0 = arith.constant 0 : index
    %c0_1 = arith.constant 0 : index
    %c0_2 = arith.constant 0 : index
    %3 = vector.load %arg2[%c0, %c0_1, %c0_2] : memref<8x8x32xbf16, #tpu.memory_space<vmem>>, vector<8x8x32xbf16>
    %c0_3 = arith.constant 0 : index
    %c0_4 = arith.constant 0 : index
    %4 = vector.load %arg3[%c0_3, %c0_4] : memref<8x8xbf16, #tpu.memory_space<vmem>>, vector<8x8xbf16>
    %5 = vector.shape_cast %4 : vector<8x8xbf16> to vector<8x8x1xbf16>
    %6 = vector.broadcast %5 : vector<8x8x1xbf16> to vector<8x8x32xbf16>
    %7 = arith.mulf %3, %6 : vector<8x8x32xbf16>
    %8 = arith.extf %7 : vector<8x8x32xbf16> to vector<8x8x32xf32>
    %c0_5 = arith.constant 0 : index
    %c0_6 = arith.constant 0 : index
    %9 = vector.load %arg9[%c0_5, %c0_6] : memref<8x32xf32, #tpu.memory_space<vmem>>, vector<8x32xf32>
    %cst = arith.constant dense<0.000000e+00> : vector<8x32xf32>
    %10 = vector.multi_reduction <add>, %8, %cst [1] : vector<8x8x32xf32> to vector<8x32xf32>
    %11 = arith.addf %9, %10 : vector<8x32xf32>
    %c0_7 = arith.constant 0 : index
    %c0_8 = arith.constant 0 : index
    %12 = vector.load %arg9[%c0_7, %c0_8] : memref<8x32xf32, #tpu.memory_space<vmem>>, vector<8x32xf32>
    tpu.vector_store %arg9[%c0_7, %c0_8], %11 {strides = array<i32>} : memref<8x32xf32, #tpu.memory_space<vmem>>, vector<8x32xf32>,
    %c0_i32_9 = arith.constant 0 : i32
    %13 = arith.cmpi eq, %arg1, %c0_i32_9 : i32
    %14 = arith.extui %13 : i1 to i32
    %c0_i32_10 = arith.constant 0 : i32
    %15 = arith.cmpi ne, %14, %c0_i32_10 : i32
    scf.if %15 {
      %c0_11 = arith.constant 0 : index
      %c0_12 = arith.constant 0 : index
      %16 = vector.load %arg9[%c0_11, %c0_12] : memref<8x32xf32, #tpu.memory_space<vmem>>, vector<8x32xf32>
      %17 = arith.truncf %16 : vector<8x32xf32> to vector<8x32xbf16>
      %c0_13 = arith.constant 0 : index
      %c0_14 = arith.constant 0 : index
      %18 = vector.load %arg5[%c0_13, %c0_14] : memref<32x32xbf16, #tpu.memory_space<vmem>>, vector<32x32xbf16>
      %cst_15 = arith.constant dense<0.000000e+00> : vector<8x32xf32>
      %19 = tpu.matmul %17, %18, %cst_15 {dimension_numbers = #tpu.dot_dimension_numbers<[1], [0], [0], [1], [0, 0, 1, 1], [], []>} : vector<8x32xbf16>, vector<32x32xbf16>, vector<8x32xf32> -> vector<8x32xf32>
      %c0_16 = arith.constant 0 : index
      %c0_17 = arith.constant 0 : index
      %20 = vector.load %arg4[%c0_16, %c0_17] : memref<8x16xbf16, #tpu.memory_space<vmem>>, vector<8x16xbf16>
      %c0_18 = arith.constant 0 : index
      %c0_19 = arith.constant 0 : index
      %21 = vector.load %arg6[%c0_18, %c0_19] : memref<16x32xbf16, #tpu.memory_space<vmem>>, vector<16x32xbf16>
      %cst_20 = arith.constant dense<0.000000e+00> : vector<8x32xf32>
      %22 = tpu.matmul %20, %21, %cst_20 {dimension_numbers = #tpu.dot_dimension_numbers<[1], [0], [0], [1], [0, 0, 1, 1], [], []>} : vector<8x16xbf16>, vector<16x32xbf16>, vector<8x32xf32> -> vector<8x32xf32>
      %23 = arith.addf %19, %22 : vector<8x32xf32>
      %c0_21 = arith.constant 0 : index
      %c0_22 = arith.constant 0 : index
      %24 = vector.load %arg7[%c0_21, %c0_22] : memref<1x32xf32, #tpu.memory_space<vmem>>, vector<1x32xf32>
      %25 = vector.broadcast %24 : vector<1x32xf32> to vector<8x32xf32>
      %26 = arith.addf %23, %25 : vector<8x32xf32>
      %c0_23 = arith.constant 0 : index
      %c0_24 = arith.constant 0 : index
      %27 = vector.load %arg8[%c0_23, %c0_24] : memref<8x32xf32, #tpu.memory_space<vmem>>, vector<8x32xf32>
      tpu.vector_store %arg8[%c0_23, %c0_24], %26 {strides = array<i32>} : memref<8x32xf32, #tpu.memory_space<vmem>>, vector<8x32xf32>,
    } else {
    }
    return
  }
  func.func @transform_0(%arg0: i32, %arg1: i32) -> (i32, i32, i32) {
    %c0_i32 = arith.constant 0 : i32
    %c0_i32_0 = arith.constant 0 : i32
    return %arg0, %arg1, %c0_i32 : i32, i32, i32
  }
  func.func @transform_1(%arg0: i32, %arg1: i32) -> (i32, i32) {
    %c0_i32 = arith.constant 0 : i32
    return %arg0, %arg1 : i32, i32
  }
  func.func @transform_2(%arg0: i32, %arg1: i32) -> (i32, i32) {
    %c0_i32 = arith.constant 0 : i32
    %c0_i32_0 = arith.constant 0 : i32
    return %arg0, %c0_i32 : i32, i32
  }
  func.func @transform_3(%arg0: i32, %arg1: i32) -> (i32, i32) {
    %c0_i32 = arith.constant 0 : i32
    %c0_i32_0 = arith.constant 0 : i32
    %c0_i32_1 = arith.constant 0 : i32
    return %c0_i32, %c0_i32_0 : i32, i32
  }
  func.func @transform_4(%arg0: i32, %arg1: i32) -> (i32, i32) {
    %c0_i32 = arith.constant 0 : i32
    %c0_i32_0 = arith.constant 0 : i32
    %c0_i32_1 = arith.constant 0 : i32
    return %c0_i32, %c0_i32_0 : i32, i32
  }
  func.func @transform_5(%arg0: i32, %arg1: i32) -> (i32, i32) {
    %c0_i32 = arith.constant 0 : i32
    %c0_i32_0 = arith.constant 0 : i32
    %c0_i32_1 = arith.constant 0 : i32
    return %c0_i32, %c0_i32_0 : i32, i32
  }
  func.func @transform_6(%arg0: i32, %arg1: i32) -> (i32, i32) {
    %c0_i32 = arith.constant 0 : i32
    %c0_i32_0 = arith.constant 0 : i32
    return %arg0, %c0_i32 : i32, i32
  }
}

</mosaic_0001>

<bundles_post_ra>
// kernel: tpu_custom_call.1
= control target key start
LH: loop header
LB: loop body
LE: loop exit
PB: predicated region body
PF: predicated region fallthrough
CT: control target
= control target key end

     0   :  { %11 = vsyncpa [#allocation4], 0  ;;  %s631_s0 = inlined_call_operand.hbm [shape: bf16[8,8,32], index: 0, kind: input, shape index: {}]   ;;  %s632_s1 = inlined_call_operand.hbm [shape: bf16[8,8], index: 1, kind: input, shape index: {}]   ;;  %s633_s2 = inlined_call_operand.vmem [shape: bf16[8,16], index: 2, kind: input, shape index: {}]   ;;  %s634_s3 = inlined_call_operand.hbm [shape: bf16[32,32], index: 3, kind: input, shape index: {}]   ;;  %s635_s4 = inlined_call_operand.vmem [shape: bf16[16,32], index: 4, kind: input, shape index: {}]   ;;  %s636_s5 = inlined_call_operand.vmem [shape: f32[1,32], index: 5, kind: input, shape index: {}]   ;;  %s637_s6 = inlined_call_operand.hbm [shape: f32[8,32], index: 6, kind: output, shape index: {}]  }
   0x1   :  { %12 = vsyncpa [#allocation7], 0 }
   0x2   :  { %13 = vsyncpa [#allocation5], 0  ;;  %s512_s21 = smov [#allocation6]   ;;  %s513_s23 = smov [#allocation3]  }
   0x3   :  { %s32_s22 = sshll.u32 %s512_s21, 4  ;;  %s19_s24 = sshll.u32 %s513_s23, 4  ;;  %s33_s22 = int_to_ptr.vmem [resolvable:$true] %s32_s22  ;;  %s555_s24 = int_to_ptr.vmem [resolvable:$true] %s19_s24 }
   0x4   :  { %s418_s27 = scalar_lea.hbm %s632_s1, 64 }
   0x5   :  { %p419_p0 = scmp.ne.s32.totalorder %s632_s1, %s418_s27  ;;  %p422_p1 = scmp.lt.u32.totalorder %s418_s27, %s632_s1 }
   0x7   :  { %p424_p2 = pnand %p422_p1, %p419_p0 }
   0x9   :  { %427 = shalt.err (!%p424_p2)
}
   0xa   :  { %s428_s8 = scalar_lea.vmem %s33_s22, 64  ;;  %p433_p4 = scmp.lt.s32.totalorder %s33_s22, %s33_s22 }
   0xb   :  { %p429_p3 = scmp.ne.s32.totalorder %s33_s22, %s428_s8  ;;  %p434_p5 = scmp.lt.s32.totalorder %s428_s8, %s428_s8 }
   0xd   :  { %p435_p6 = por %p434_p5, %p433_p4 }
   0xf   :  { %p436_p7 = pnand %p435_p6, %p429_p3 }
  0x11   :  { %439 = shalt.err (!%p436_p7)
}
  0x12   :  { %35 = dma.hbm_to_vmem [thread:$0]  %s632_s1, 64, %s33_s22, [#allocation7]  }
  0x13   :  { %s440_s13 = scalar_lea.hbm %s631_s0, 512 }
  0x14   :  { %p441_p8 = scmp.ne.s32.totalorder %s631_s0, %s440_s13  ;;  %p444_p9 = scmp.lt.u32.totalorder %s440_s13, %s631_s0 }
  0x16   :  { %p446_p10 = pnand %p444_p9, %p441_p8 }
  0x18   :  { %449 = shalt.err (!%p446_p10)
}
  0x19   :  { %s450_s18 = scalar_lea.vmem %s555_s24, 512  ;;  %p455_p12 = scmp.lt.s32.totalorder %s555_s24, %s555_s24 }
  0x1a   :  { %p451_p11 = scmp.ne.s32.totalorder %s555_s24, %s450_s18  ;;  %p456_p13 = scmp.lt.s32.totalorder %s450_s18, %s450_s18 }
  0x1c   :  { %p457_p0 = por %p456_p13, %p455_p12 }
  0x1e   :  { %p458_p1 = pnand %p457_p0, %p451_p11 }
  0x20   :  { %461 = shalt.err (!%p458_p1)
}
  0x21   :  { %s514_s1 = smov 64   ;;  %s515_s19 = smov 4  }
  0x22   :  { %25 = dma.hbm_to_vmem [thread:$0]  %s631_s0, 512, %s555_s24, [#allocation4], %s514_s1, %s514_s1, %s515_s19  }
  0x23   :  { %s516_s22 = smov [#allocation8]   ;;  %s462_s27 = scalar_lea.hbm %s634_s3, 256 }
  0x24   :  { %s43_s23 = sshll.u32 %s516_s22, 4  ;;  %p463_p2 = scmp.ne.s32.totalorder %s634_s3, %s462_s27  ;;  %s44_s23 = int_to_ptr.vmem [resolvable:$true] %s43_s23 }
  0x25   :  { %p466_p3 = scmp.lt.u32.totalorder %s462_s27, %s634_s3 }
  0x27   :  { %p468_p4 = pnand %p466_p3, %p463_p2 }
  0x29   :  { %471 = shalt.err (!%p468_p4)
}
  0x2a   :  { %s472_s8 = scalar_lea.vmem %s44_s23, 256  ;;  %p477_p6 = scmp.lt.s32.totalorder %s44_s23, %s44_s23 }
  0x2b   :  { %p473_p5 = scmp.ne.s32.totalorder %s44_s23, %s472_s8  ;;  %p478_p7 = scmp.lt.s32.totalorder %s472_s8, %s472_s8 }
  0x2d   :  { %p479_p8 = por %p478_p7, %p477_p6 }
  0x2f   :  { %p480_p9 = pnand %p479_p8, %p473_p5 }
  0x31   :  { %483 = shalt.err (!%p480_p9)
}
  0x32   :  { %49 = dma.hbm_to_vmem [thread:$0]  %s634_s3, 256, %s44_s23, [#allocation7], %s514_s1, %s514_s1, %s515_s19  }
  0x33   :  { %506 = dma.done.wait [#allocation4], 512  }
  0x34   :  { %507 = vsyncadd [#allocation4], 4294966784 }
  0x35   :  { %508 = dma.done.wait [#allocation7], 320  }
  0x36   :  { %509 = vsyncadd [#allocation7], 4294966976  ;;  %v82_v0 = vlaneseq  ;;  %v78_v4 = vld [vmem:[#allocation6] sm:$0xf]  ;;  %vm68_vm0 = vcmask 261120   ;;  %v517_v18 = vmov 0.0  }
  0x37   :  { %v80_v5 = vpack.i.b16 %v78_v4, %v78_v4  ;;  %v89_v6 = vshrl.u32 %v78_v4, 16  ;;  %69 = vst.msk [vmem:[#allocation2] sm:$0xff] %vm68_vm0, %v517_v18  ;;  %399 = vmatprep.subr.bf16.mxu1 %v517_v18  ;;  %393 = vmatprep.subr.bf16.mxu0 %v517_v18  ;;  %v415_v19 = vld [vmem:[#allocation8] sm:$0xff]   ;;  %v416_v20 = vld [vmem:[%s635_s4] sm:$0xff]   ;;  %vm518_vm1 = vmmov 0   ;;  %vm258_vm2 = vcmask 130048  }
  0x38   :  { %v83_v1 = vshrl.u32 %v82_v0, 7  ;;  %395 = vmatprep.mubr.msk.bf16.mxu0 %vm518_vm1, %v517_v18  ;;  %403 = vmatprep.mubr.msk.bf16.mxu1 %vm518_vm1, %v517_v18  ;;  %v249_v21 = vld [vmem:[%s633_s2] sm:$0xf]  ;;  %v417_v22 = vld [vmem:[#allocation8 + $0x8] sm:$0xff]   ;;  %v72_v23 = vld [vmem:[#allocation3 + $0x8] sm:$0xf] }
  0x39   :  { %v90_v9 = vpack.i.b16 %v89_v6, %v89_v6  ;;  %400 = vmatpush3.bf16.msra.mxu1 %v415_v19  ;;  %394 = vmatpush3.bf16.msra.mxu0 %v416_v20  ;;  %v70_v24 = vld [vmem:[#allocation3] sm:$0xf]  ;;  %v73_v29 = vld [vmem:[#allocation3 + $0xc] sm:$0xf]  ;;  %v71_v30 = vld [vmem:[#allocation3 + $0x4] sm:$0xf] }
  0x3a   :  { %v101_v2 = vsub.s32 1, %v83_v1  ;;  %v84_v3 = vsub.s32 0, %v83_v1  ;;  %v115_v12 = vsub.s32 2, %v83_v1  ;;  %v129_v15 = vsub.s32 3, %v83_v1  ;;  %401 = vmatprep.subr.bf16.mxu1 %v517_v18  ;;  %v75_v41 = vld [vmem:[#allocation3 + $0x14] sm:$0xf] }
  0x3b   :  { %v74_v42 = vld [vmem:[#allocation3 + $0x10] sm:$0xf]  ;;  %v77_v53 = vld [vmem:[#allocation3 + $0x1c] sm:$0xf]  ;;  %v76_v58 = vld [vmem:[#allocation3 + $0x18] sm:$0xf] }
  0x3c   :  { %v102_v7 = vrot.slane %v80_v5, %v101_v2  ;;  %v85_v8 = vrot.slane %v80_v5, %v84_v3  ;;  %v109_v10 = vrot.slane %v90_v9, %v101_v2  ;;  %v95_v11 = vrot.slane %v90_v9, %v84_v3  ;;  %396 = vmatmul.mubr.msk.bf16.vlgmr.msra.gmra.mrb[0].mxu0 %vm258_vm2, %v249_v21  ;;  %s519_s12 = smov [#allocation9]  }
  0x3d   :  { %v123_v13 = vrot.slane %v90_v9, %v115_v12  ;;  %v116_v14 = vrot.slane %v80_v5, %v115_v12  ;;  %v137_v16 = vrot.slane %v90_v9, %v129_v15  ;;  %v130_v17 = vrot.slane %v80_v5, %v129_v15  ;;  %402 = vmatpush3.bf16.msra.mxu1 %v417_v22  ;;  %s372_s13 = sshll.u32 %s519_s12, 4  ;;  %s373_s13 = int_to_ptr.vmem [resolvable:$true] %s372_s13 }
  0x3e   :  { %104 = vbcast.lane.c.b16.xlu1 %v102_v7, 256  ;;  %87 = vbcast.lane.c.b16.xlu0 %v85_v8, 256  ;;  %vm223_vm3 = vcmask 1041409   ;;  %vm225_vm4 = vcmask 1042434   ;;  %vm227_vm5 = vcmask 1043459   ;;  %vm229_vm6 = vcmask 1044484   ;;  %p489_p11 = scmp.lt.s32.totalorder %s373_s13, %s373_s13 }
  0x3f   :  { %vm231_vm7 = vcmask 1045509   ;;  %vm233_vm8 = vcmask 1046534   ;;  %vm235_vm9 = vcmask 1047559   ;;  %s484_s14 = scalar_lea.vmem %s373_s13, 128 }
  0x40   :  { %p485_p10 = scmp.ne.s32.totalorder %s373_s13, %s484_s14  ;;  %p490_p12 = scmp.lt.s32.totalorder %s484_s14, %s484_s14 }
  0x42   :  { %111 = vbcast.lane.c.b16.xlu1 %v109_v10, 256  ;;  %97 = vbcast.lane.c.b16.xlu0 %v95_v11, 256  ;;  %p491_p13 = por %p490_p12, %p489_p11 }
  0x44   :  { %p492_p0 = pnand %p491_p13, %p485_p10 }
  0x46   :  { %125 = vbcast.lane.c.b16.xlu1 %v123_v13, 256  ;;  %118 = vbcast.lane.c.b16.xlu0 %v116_v14, 256 }
  0x4a   :  { %139 = vbcast.lane.c.b16.xlu1 %v137_v16, 256  ;;  %132 = vbcast.lane.c.b16.xlu0 %v130_v17, 256 }
  0xb0   :  { %v105_v25 = vpop.permute.xlu1 %104  ;;  %v88_v26 = vpop.permute.xlu0 %87 }
  0xb1   :  { %v143_v27 = vmul.bf16 %v105_v25, %v72_v23  ;;  %v141_v28 = vmul.bf16 %v88_v26, %v70_v24 }
  0xb3   :  { %v151_v31 = vunpack.c.l.bf16 %v143_v27  ;;  %v149_v32 = vunpack.c.l.bf16 %v141_v28 }
  0xb4   :  { %v112_v33 = vpop.permute.xlu1 %111  ;;  %v98_v34 = vpop.permute.xlu0 %97 }
  0xb5   :  { %v173_v35 = vsel %vm68_vm0, %v151_v31, 0.0  ;;  %v159_v36 = vsel %vm68_vm0, %v149_v32, 0.0  ;;  %v144_v37 = vmul.bf16 %v112_v33, %v73_v29  ;;  %v142_v38 = vmul.bf16 %v98_v34, %v71_v30 }
  0xb6   :  { %v174_v39 = vrot.slane %v173_v35, 4  ;;  %v160_v40 = vrot.slane %v159_v36, 4 }
  0xb7   :  { %v152_v43 = vunpack.c.l.bf16 %v144_v37  ;;  %v150_v44 = vunpack.c.l.bf16 %v142_v38 }
  0xb8   :  { %v175_v45 = vadd.f32 %v174_v39, %v173_v35  ;;  %v161_v46 = vadd.f32 %v160_v40, %v159_v36  ;;  %v126_v47 = vpop.permute.xlu1 %125  ;;  %v119_v48 = vpop.permute.xlu0 %118 }
  0xb9   :  { %v180_v49 = vsel %vm68_vm0, %v152_v43, 0.0  ;;  %v166_v50 = vsel %vm68_vm0, %v150_v44, 0.0  ;;  %v146_v51 = vmul.bf16 %v126_v47, %v75_v41  ;;  %v145_v52 = vmul.bf16 %v119_v48, %v74_v42 }
  0xba   :  { %v176_v54 = vrot.slane %v175_v45, 2  ;;  %v162_v55 = vrot.slane %v161_v46, 2  ;;  %v181_v56 = vrot.slane %v180_v49, 4  ;;  %v167_v57 = vrot.slane %v166_v50, 4 }
  0xbb   :  { %v154_v59 = vunpack.c.l.bf16 %v146_v51  ;;  %v153_v60 = vunpack.c.l.bf16 %v145_v52  ;;  %v157_v52 = vld [vmem:[#allocation2] sm:$0xff] }
  0xbc   :  { %v177_v61 = vadd.f32 %v176_v54, %v175_v45  ;;  %v163_v62 = vadd.f32 %v162_v55, %v161_v46  ;;  %v182_v63 = vadd.f32 %v181_v56, %v180_v49  ;;  %v168_v0 = vadd.f32 %v167_v57, %v166_v50  ;;  %v140_v1 = vpop.permute.xlu1 %139  ;;  %v133_v2 = vpop.permute.xlu0 %132 }
  0xbd   :  { %v194_v3 = vsel %vm68_vm0, %v154_v59, 0.0  ;;  %v187_v4 = vsel %vm68_vm0, %v153_v60, 0.0  ;;  %v148_v5 = vmul.bf16 %v140_v1, %v77_v53  ;;  %v147_v6 = vmul.bf16 %v133_v2, %v76_v58 }
  0xbe   :  { %v183_v7 = vrot.slane %v182_v63, 2  ;;  %v169_v8 = vrot.slane %v168_v0, 2  ;;  %v195_v9 = vrot.slane %v194_v3, 4  ;;  %v188_v10 = vrot.slane %v187_v4, 4 }
  0xbf   :  { %v156_v11 = vunpack.c.l.bf16 %v148_v5  ;;  %v155_v12 = vunpack.c.l.bf16 %v147_v6  ;;  %v178_v13 = vrot.slane %v177_v61, 1  ;;  %v164_v14 = vrot.slane %v163_v62, 1 }
  0xc0   :  { %v184_v15 = vadd.f32 %v183_v7, %v182_v63  ;;  %v170_v16 = vadd.f32 %v169_v8, %v168_v0  ;;  %v196_v17 = vadd.f32 %v195_v9, %v194_v3  ;;  %v189_v18 = vadd.f32 %v188_v10, %v187_v4  ;;  %v387_v63 = vld [vmem:[%s636_s5] ss:$0 sm:$0xff] }
  0xc1   :  { %v208_v19 = vsel %vm68_vm0, %v156_v11, 0.0  ;;  %v201_v20 = vsel %vm68_vm0, %v155_v12, 0.0  ;;  %v165_v27 = vadd.f32 %v164_v14, %v163_v62  ;;  %v179_v31 = vadd.f32 %v178_v13, %v177_v61 }
  0xc2   :  { %v185_v21 = vrot.slane %v184_v15, 1  ;;  %v171_v22 = vrot.slane %v170_v16, 1  ;;  %v209_v23 = vrot.slane %v208_v19, 4  ;;  %v202_v24 = vrot.slane %v201_v20, 4 }
  0xc3   :  { %v197_v25 = vrot.slane %v196_v17, 2  ;;  %v190_v26 = vrot.slane %v189_v18, 2 }
  0xc4   :  { %v172_v28 = vadd.f32 %v171_v22, %v170_v16  ;;  %v210_v29 = vadd.f32 %v209_v23, %v208_v19  ;;  %v203_v30 = vadd.f32 %v202_v24, %v201_v20  ;;  %v186_v34 = vadd.f32 %v185_v21, %v184_v15 }
  0xc5   :  { %v198_v32 = vadd.f32 %v197_v25, %v196_v17  ;;  %v191_v33 = vadd.f32 %v190_v26, %v189_v18 }
  0xc6   :  { %v224_v35 = vsel %vm223_vm3, %v172_v28, %v165_v27  ;;  %v211_v36 = vrot.slane %v210_v29, 2  ;;  %v204_v37 = vrot.slane %v203_v30, 2 }
  0xc7   :  { %v226_v38 = vsel %vm225_vm4, %v179_v31, %v224_v35  ;;  %v199_v39 = vrot.slane %v198_v32, 1  ;;  %v192_v40 = vrot.slane %v191_v33, 1 }
  0xc8   :  { %v228_v41 = vsel %vm227_vm5, %v186_v34, %v226_v38  ;;  %v212_v42 = vadd.f32 %v211_v36, %v210_v29  ;;  %v205_v43 = vadd.f32 %v204_v37, %v203_v30 }
  0xc9   :  { %v200_v44 = vadd.f32 %v199_v39, %v198_v32  ;;  %v193_v45 = vadd.f32 %v192_v40, %v191_v33 }
  0xca   :  { %v213_v46 = vrot.slane %v212_v42, 1  ;;  %v206_v47 = vrot.slane %v205_v43, 1 }
  0xcb   :  { %v230_v48 = vsel %vm229_vm6, %v193_v45, %v228_v41 }
  0xcc   :  { %v214_v49 = vadd.f32 %v213_v46, %v212_v42  ;;  %v207_v50 = vadd.f32 %v206_v47, %v205_v43  ;;  %v232_v51 = vsel %vm231_vm7, %v200_v44, %v230_v48 }
  0xce   :  { %v234_v53 = vsel %vm233_vm8, %v207_v50, %v232_v51 }
  0xcf   :  { %v236_v54 = vsel %vm235_vm9, %v214_v49, %v234_v53 }
  0xd0   :  { %v238_v55 = vadd.f32 %v236_v54, %v157_v52 }
  0xd2   :  { %239 = vst.msk [vmem:[#allocation2] sm:$0xff] %vm68_vm0, %v238_v55 }
  0xd9   :  { %v243_v56 = vld [vmem:[#allocation2] sm:$0xff] }
  0xda   :  { %v244_v57 = vpack.c.bf16 %v243_v56, %v243_v56 }
  0xdc   :  { %404 = vmatmul.mubr.msk.bf16.vlgmr.msra.gmra.mrb[0].mxu1 %vm68_vm0, %v244_v57 }
 0x10f   :  { %v296_v58 = vpop.f32.mrb[0].mxu0 }
 0x110   :  { %v397_v59 = vpop.f32.mrb[1].mxu0 }
 0x111   :  { %v299_v60 = vpop.f32.mrb[2].mxu0 }
 0x112   :  { %v398_v61 = vpop.f32.mrb[3].mxu0 }
 0x1af   :  { %v351_v62 = vpop.f32.mrb[0].mxu1 }
 0x1b0   :  { %v352_v0 = vadd.f32 %v351_v62, %v296_v58  ;;  %v405_v1 = vpop.f32.mrb[1].mxu1 }
 0x1b1   :  { %v354_v2 = vpop.f32.mrb[2].mxu1 }
 0x1b2   :  { %v364_v3 = vadd.f32 %v387_v63, %v352_v0  ;;  %v406_v4 = vpop.f32.mrb[3].mxu1 }
 0x1b4   :  { %365 = vst.msk [vmem:[#allocation9] sm:$0xff] %vm68_vm0, %v364_v3 }
 0x1b5   :  { %495 = shalt.err (!%p492_p0)
}
 0x1b6   :  { %s496_s5 = scalar_lea.hbm %s637_s6, 128 }
 0x1b7   :  { %p497_p1 = scmp.ne.s32.totalorder %s637_s6, %s496_s5  ;;  %p500_p2 = scmp.lt.u32.totalorder %s496_s5, %s637_s6 }
 0x1b9   :  { %p502_p3 = pnand %p500_p2, %p497_p1 }
 0x1bb   :  { %505 = shalt.err (!%p502_p3)
}
 0x1bc   :  { %375 = dma.vmem_to_hbm [thread:$0]  %s373_s13, 128, %s637_s6, [#allocation5]  }
 0x1bd   :  { %510 = dma.done.wait [#allocation5], 128  }
 0x1be   :  { %511 = vsyncadd [#allocation5], 4294967168 }
 0x1bf   :  { %379 = vsyncpa [#allocation4], 1 }
 0x1c0   :  { %380 = vsyncpa [#allocation7], 1 }
 0x1c1   :  { %381 = vsyncpa [#allocation5], 1 }

</bundles_post_ra>
